<compile_context>
chip_gen: v7x
topology: tpu7x:2x2x1
jax: 0.10.0
libtpu: 0.0.40
codegen_flags: <defaults>
</compile_context>

<pallas_src>
import jax
import jax.numpy as jnp
from jax.experimental import pallas as pl
from jax.experimental.pallas import tpu as pltpu


def _mutual_attention_kernel(src_ref, tgt_ref, wxq_ref, bq_ref, wt_ref, btt_ref, o_ref):
    # src_ref / tgt_ref / o_ref : (Bt, C, L)
    # wxq_ref : (att + c_n, C)   rows [0:att] = folded (ws@wl@wa), rows [att:] = wb
    # bq_ref  : (att, 1)         folded bias  (ws@wl@ba + ws@bl + bs)
    # wt_ref  : (att, C)  linearT weight      btt_ref : (att, 1)  linearT bias
    att = wt_ref.shape[0]
    bt_blk = src_ref.shape[0]

    x = src_ref[...]                                     # (Bt, C, L)
    t = tgt_ref[...]                                     # (Bt, C, L)

    # --- single stacked MXU call against the source block (batched over Bt, L on lanes) ---
    w_x = jnp.broadcast_to(wxq_ref[...][None], (bt_blk,) + tuple(wxq_ref.shape))
    z = jnp.einsum("brc,bcl->brl", w_x, x, preferred_element_type=jnp.float32)
    q = z[:, :att, :]                                    # (Bt, att, L) == (ws wl wa) @ x
    blog = z[:, att:, :]                                 # (Bt, c_n, L) == wb @ x (bb dropped)

    # softmax over seq_len (lane axis)
    blog = blog - jnp.max(blog, axis=-1, keepdims=True)
    e = jnp.exp(blog)
    inv_den = pl.reciprocal(jnp.sum(e, axis=-1, keepdims=True), approx=True)   # EUP
    attw = e * inv_den                                   # (Bt, c_n, L)

    # mean over c_n pushed through the bmm; folded linear chain on the global descriptor
    v = jnp.mean(attw, axis=1, keepdims=True)            # (Bt, 1, L)
    gs = jnp.sum(q * v, axis=-1, keepdims=True) + bq_ref[...][None]    # (Bt, att, 1)

    # linearT applied along channels, still NCW
    w_t = jnp.broadcast_to(wt_ref[...][None], (bt_blk,) + tuple(wt_ref.shape))
    tt = jnp.einsum("brc,bcl->brl", w_t, t, preferred_element_type=jnp.float32)
    tt = tt + btt_ref[...][None]                         # (Bt, att, L)

    # attention scores: contract over att (sublane reduce), then sigmoid via EUP reciprocal
    am = jnp.sum(gs * tt, axis=1, keepdims=True)         # (Bt, 1, L)
    sig = pl.reciprocal(1.0 + jnp.exp(-am), approx=True)

    out = t * (1.0 + sig)                                # target + target * att_maps
    o_ref[...] = jnp.maximum(out, 0.0).astype(o_ref.dtype)


def mutual_attentation(source, target, params, *, target_block_bytes=1 << 20):
    """source/target: (B, C, L) PyTorch NCW layout (kept as-is, no transposes)."""
    batch, c_in, seq = source.shape
    c_n = params["wb"].shape[0]
    att = params["ws"].shape[0]

    # Fold linearS o bipool.linear o convA into one (att, C) matrix + (att,) bias.
    # Exact identities: sum_l softmax == 1, and softmax is invariant to the per-channel bb.
    wsl = params["ws"] @ params["wl"]                        # (att, c_m)
    w_q = wsl @ params["wa"]                                 # (att, C)
    b_q = wsl @ params["ba"] + params["ws"] @ params["bl"] + params["bs"]   # (att,)
    w_stack = jnp.concatenate([w_q, params["wb"]], axis=0)   # (att + c_n, C)

    bq2 = b_q.reshape(att, 1)
    bt2 = params["bt"].reshape(att, 1)

    # Batch tile: ~target_block_bytes per input block, grid length >= 2 when possible
    # (v7x megacore), Bt must divide B.
    elem_bytes = c_in * seq * source.dtype.itemsize
    bt_blk = max(1, min(batch, target_block_bytes // max(elem_bytes, 1)))
    if batch >= 2:
        bt_blk = max(1, min(bt_blk, batch // 2))
    while batch % bt_blk:
        bt_blk -= 1
    grid = (batch // bt_blk,)

    weight_elems = w_stack.size + att * (c_in + 2)
    cost = pl.CostEstimate(
        flops=2 * batch * seq * c_in * (att + c_n + att) + 10 * batch * c_in * seq,
        transcendentals=batch * seq * (c_n + 1),
        bytes_accessed=source.dtype.itemsize * 3 * batch * c_in * seq + 4 * weight_elems,
    )

    return pl.pallas_call(
        _mutual_attention_kernel,
        out_shape=jax.ShapeDtypeStruct((batch, c_in, seq), source.dtype),
        grid_spec=pltpu.PrefetchScalarGridSpec(
            num_scalar_prefetch=0,
            grid=grid,
            in_specs=[
                pl.BlockSpec((bt_blk, c_in, seq), lambda i: (i, 0, 0)),
                pl.BlockSpec((bt_blk, c_in, seq), lambda i: (i, 0, 0)),
                pl.BlockSpec((att + c_n, c_in), lambda i: (0, 0)),
                pl.BlockSpec((att, 1), lambda i: (0, 0)),
                pl.BlockSpec((att, c_in), lambda i: (0, 0)),
                pl.BlockSpec((att, 1), lambda i: (0, 0)),
            ],
            out_specs=pl.BlockSpec((bt_blk, c_in, seq), lambda i: (i, 0, 0)),
        ),
        compiler_params=pltpu.CompilerParams(
            dimension_semantics=("parallel",),
        ),
        cost_estimate=cost,
    )(source, target, w_stack, bq2, params["wt"], bt2)


def _reference(source, target, p):
    # Pure-JAX mirror of the PyTorch module (unfused, includes bb and the full linear chain).
    a = jnp.einsum("mc,bcl->bml", p["wa"], source) + p["ba"][None, :, None]
    bmat = jnp.einsum("nc,bcl->bnl", p["wb"], source) + p["bb"][None, :, None]
    att = jax.nn.softmax(bmat, axis=-1)
    gdesc = jnp.mean(jnp.einsum("bml,bnl->bmn", a, att), axis=-1)       # (B, c_m)
    gd = gdesc @ p["wl"].T + p["bl"]                                    # bipool.linear
    gd = gd[:, None, :]                                                 # (B, 1, C)
    gs = gd @ p["ws"].T + p["bs"]                                       # linearS
    tt = jnp.einsum("ac,bcl->bal", p["wt"], target) + p["bt"][None, :, None]
    am = jax.nn.sigmoid(jnp.einsum("boa,bal->bol", gs, tt))             # (B, 1, L)
    out = target + target * am
    return jnp.maximum(out, 0.0)


if __name__ == "__main__":
    key = jax.random.PRNGKey(0)
    ks = jax.random.split(key, 12)

    # Small shapes consistent with the module; batch=8 so the batched (Bt>1) path and a
    # grid of length >= 2 are both exercised.  in_channels=8, seq_len=128 (lane-dense),
    # c_m=8, c_n=4, att_size=8.
    B, C, L = 8, 8, 128
    C_M, C_N, ATT = 8, 4, 8

    def uniform(k, shape, fan_in):
        bound = 1.0 / jnp.sqrt(jnp.float32(fan_in))
        return jax.random.uniform(k, shape, minval=-bound, maxval=bound,
                                  dtype=jnp.float32)

    source = jax.random.normal(ks[0], (B, C, L), dtype=jnp.float32)
    target = jax.random.normal(ks[1], (B, C, L), dtype=jnp.float32)

    params = dict(
        wa=uniform(ks[2], (C_M, C), C),  ba=uniform(ks[3], (C_M,), C),
        wb=uniform(ks[4], (C_N, C), C),  bb=uniform(ks[5], (C_N,), C),
        wl=uniform(ks[6], (C, C_M), C_M), bl=uniform(ks[7], (C,), C_M),
        ws=uniform(ks[8], (ATT, C), C),  bs=uniform(ks[9], (ATT,), C),
        wt=uniform(ks[10], (ATT, C), C), bt=uniform(ks[11], (ATT,), C),
    )

    out = mutual_attentation(source, target, params)
    out = jax.block_until_ready(out)

    ref = _reference(source, target, params)
    assert out.shape == (B, C, L)
    # Tolerance loosened slightly because softmax denom / sigmoid use pl.reciprocal(approx=True).
    assert jnp.allclose(out, ref, atol=5e-3, rtol=5e-3), "mismatch vs pure-JAX reference"

    print("KERNEL_OK")
</pallas_src>

<mosaic_0001>
module attributes {stable_mosaic.version = 11 : i64} {
  func.func @_mutual_attention_kernel(%arg0: i32, %arg1: memref<4x8x128xf32, #tpu.memory_space<vmem>>, %arg2: memref<4x8x128xf32, #tpu.memory_space<vmem>>, %arg3: memref<12x8xf32, #tpu.memory_space<vmem>>, %arg4: memref<8x1xf32, #tpu.memory_space<vmem>>, %arg5: memref<8x8xf32, #tpu.memory_space<vmem>>, %arg6: memref<8x1xf32, #tpu.memory_space<vmem>>, %arg7: memref<4x8x128xf32, #tpu.memory_space<vmem>>) attributes {dimension_semantics = [#tpu.dimension_semantics<parallel>], iteration_bounds = array<i64: 2>, scalar_prefetch = 0 : i64, scratch_operands = 0 : i64, tpu.core_type = #tpu.core_type<tc>, window_params = [{transform_indices = @transform_0, window_bounds = array<i64: 4, 8, 128>}, {transform_indices = @transform_1, window_bounds = array<i64: 4, 8, 128>}, {pipeline_mode = #tpu.pipeline_mode<synchronous>, transform_indices = @transform_2, window_bounds = array<i64: 12, 8>}, {pipeline_mode = #tpu.pipeline_mode<synchronous>, transform_indices = @transform_3, window_bounds = array<i64: 8, 1>}, {pipeline_mode = #tpu.pipeline_mode<synchronous>, transform_indices = @transform_4, window_bounds = array<i64: 8, 8>}, {pipeline_mode = #tpu.pipeline_mode<synchronous>, transform_indices = @transform_5, window_bounds = array<i64: 8, 1>}, {transform_indices = @transform_6, window_bounds = array<i64: 4, 8, 128>}]} {
    %c0 = arith.constant 0 : index
    %c0_0 = arith.constant 0 : index
    %c0_1 = arith.constant 0 : index
    %0 = vector.load %arg1[%c0, %c0_0, %c0_1] : memref<4x8x128xf32, #tpu.memory_space<vmem>>, vector<4x8x128xf32>
    %c0_2 = arith.constant 0 : index
    %c0_3 = arith.constant 0 : index
    %c0_4 = arith.constant 0 : index
    %1 = vector.load %arg2[%c0_2, %c0_3, %c0_4] : memref<4x8x128xf32, #tpu.memory_space<vmem>>, vector<4x8x128xf32>
    %c0_5 = arith.constant 0 : index
    %c0_6 = arith.constant 0 : index
    %2 = vector.load %arg3[%c0_5, %c0_6] : memref<12x8xf32, #tpu.memory_space<vmem>>, vector<12x8xf32>
    %3 = vector.shape_cast %2 : vector<12x8xf32> to vector<1x12x8xf32>
    %4 = vector.shape_cast %3 : vector<1x12x8xf32> to vector<1x12x8xf32>
    %5 = vector.broadcast %4 : vector<1x12x8xf32> to vector<4x12x8xf32>
    "tpu.trace_start"() <{level = 10 : i32, message = "brc,bcl->brl"}> : () -> ()
    %cst = arith.constant dense<0.000000e+00> : vector<4x12x128xf32>
    %6 = tpu.matmul %5, %0, %cst {dimension_numbers = #tpu.dot_dimension_numbers<[2], [1], [1], [2], [0, 0, 0, 1, 1, 2], [0], [0]>} : vector<4x12x8xf32>, vector<4x8x128xf32>, vector<4x12x128xf32> -> vector<4x12x128xf32>
    "tpu.trace_stop"() : () -> ()
    %7 = vector.extract_strided_slice %6 {offsets = [0, 0, 0], sizes = [4, 8, 128], strides = [1, 1, 1]} : vector<4x12x128xf32> to vector<4x8x128xf32>
    %8 = vector.extract_strided_slice %6 {offsets = [0, 8, 0], sizes = [4, 4, 128], strides = [1, 1, 1]} : vector<4x12x128xf32> to vector<4x4x128xf32>
    %cst_7 = arith.constant dense<0xFF800000> : vector<4x4xf32>
    %9 = vector.multi_reduction <maximumf>, %8, %cst_7 [2] : vector<4x4x128xf32> to vector<4x4xf32>
    %10 = vector.shape_cast %9 : vector<4x4xf32> to vector<4x4x1xf32>
    %11 = vector.broadcast %10 : vector<4x4x1xf32> to vector<4x4x128xf32>
    %12 = arith.subf %8, %11 : vector<4x4x128xf32>
    %13 = math.exp %12 : vector<4x4x128xf32>
    %cst_8 = arith.constant dense<0.000000e+00> : vector<4x4xf32>
    %14 = vector.multi_reduction <add>, %13, %cst_8 [2] : vector<4x4x128xf32> to vector<4x4xf32>
    %15 = vector.shape_cast %14 : vector<4x4xf32> to vector<4x4x1xf32>
    %16 = tpu.reciprocal %15 {approx = true} : vector<4x4x1xf32> -> vector<4x4x1xf32>
    %17 = vector.broadcast %16 : vector<4x4x1xf32> to vector<4x4x128xf32>
    %18 = arith.mulf %13, %17 : vector<4x4x128xf32>
    %cst_9 = arith.constant dense<0.000000e+00> : vector<4x128xf32>
    %19 = vector.multi_reduction <add>, %18, %cst_9 [1] : vector<4x4x128xf32> to vector<4x128xf32>
    %20 = vector.shape_cast %19 : vector<4x128xf32> to vector<4x1x128xf32>
    %cst_10 = arith.constant 4.000000e+00 : f32
    %21 = vector.broadcast %cst_10 : f32 to vector<4x1x128xf32>
    %22 = arith.divf %20, %21 : vector<4x1x128xf32>
    %23 = vector.broadcast %22 : vector<4x1x128xf32> to vector<4x8x128xf32>
    %24 = arith.mulf %7, %23 : vector<4x8x128xf32>
    %cst_11 = arith.constant dense<0.000000e+00> : vector<4x8xf32>
    %25 = vector.multi_reduction <add>, %24, %cst_11 [2] : vector<4x8x128xf32> to vector<4x8xf32>
    %26 = vector.shape_cast %25 : vector<4x8xf32> to vector<4x8x1xf32>
    %c0_12 = arith.constant 0 : index
    %c0_13 = arith.constant 0 : index
    %27 = vector.load %arg4[%c0_12, %c0_13] : memref<8x1xf32, #tpu.memory_space<vmem>>, vector<8x1xf32>
    %28 = vector.shape_cast %27 : vector<8x1xf32> to vector<1x8x1xf32>
    %29 = vector.broadcast %28 : vector<1x8x1xf32> to vector<4x8x1xf32>
    %30 = arith.addf %26, %29 : vector<4x8x1xf32>
    %c0_14 = arith.constant 0 : index
    %c0_15 = arith.constant 0 : index
    %31 = vector.load %arg5[%c0_14, %c0_15] : memref<8x8xf32, #tpu.memory_space<vmem>>, vector<8x8xf32>
    %32 = vector.shape_cast %31 : vector<8x8xf32> to vector<1x8x8xf32>
    %33 = vector.shape_cast %32 : vector<1x8x8xf32> to vector<1x8x8xf32>
    %34 = vector.broadcast %33 : vector<1x8x8xf32> to vector<4x8x8xf32>
    "tpu.trace_start"() <{level = 10 : i32, message = "brc,bcl->brl"}> : () -> ()
    %cst_16 = arith.constant dense<0.000000e+00> : vector<4x8x128xf32>
    %35 = tpu.matmul %34, %1, %cst_16 {dimension_numbers = #tpu.dot_dimension_numbers<[2], [1], [1], [2], [0, 0, 0, 1, 1, 2], [0], [0]>} : vector<4x8x8xf32>, vector<4x8x128xf32>, vector<4x8x128xf32> -> vector<4x8x128xf32>
    "tpu.trace_stop"() : () -> ()
    %c0_17 = arith.constant 0 : index
    %c0_18 = arith.constant 0 : index
    %36 = vector.load %arg6[%c0_17, %c0_18] : memref<8x1xf32, #tpu.memory_space<vmem>>, vector<8x1xf32>
    %37 = vector.shape_cast %36 : vector<8x1xf32> to vector<1x8x1xf32>
    %38 = vector.broadcast %37 : vector<1x8x1xf32> to vector<4x8x128xf32>
    %39 = arith.addf %35, %38 : vector<4x8x128xf32>
    %40 = vector.broadcast %30 : vector<4x8x1xf32> to vector<4x8x128xf32>
    %41 = arith.mulf %40, %39 : vector<4x8x128xf32>
    %cst_19 = arith.constant dense<0.000000e+00> : vector<4x128xf32>
    %42 = vector.multi_reduction <add>, %41, %cst_19 [1] : vector<4x8x128xf32> to vector<4x128xf32>
    %43 = vector.shape_cast %42 : vector<4x128xf32> to vector<4x1x128xf32>
    %cst_20 = arith.constant 0.000000e+00 : f32
    %44 = vector.broadcast %cst_20 : f32 to vector<4x1x128xf32>
    %45 = arith.subf %44, %43 : vector<4x1x128xf32>
    %46 = math.exp %45 : vector<4x1x128xf32>
    %cst_21 = arith.constant 1.000000e+00 : f32
    %47 = vector.broadcast %cst_21 : f32 to vector<4x1x128xf32>
    %48 = arith.addf %47, %46 : vector<4x1x128xf32>
    %49 = tpu.reciprocal %48 {approx = true} : vector<4x1x128xf32> -> vector<4x1x128xf32>
    %cst_22 = arith.constant 1.000000e+00 : f32
    %50 = vector.broadcast %cst_22 : f32 to vector<4x1x128xf32>
    %51 = arith.addf %50, %49 : vector<4x1x128xf32>
    %52 = vector.broadcast %51 : vector<4x1x128xf32> to vector<4x8x128xf32>
    %53 = arith.mulf %1, %52 : vector<4x8x128xf32>
    %cst_23 = arith.constant 0.000000e+00 : f32
    %54 = vector.broadcast %cst_23 : f32 to vector<4x8x128xf32>
    %55 = arith.maximumf %53, %54 : vector<4x8x128xf32>
    %c0_24 = arith.constant 0 : index
    %c0_25 = arith.constant 0 : index
    %c0_26 = arith.constant 0 : index
    %56 = vector.load %arg7[%c0_24, %c0_25, %c0_26] : memref<4x8x128xf32, #tpu.memory_space<vmem>>, vector<4x8x128xf32>
    tpu.vector_store %arg7[%c0_24, %c0_25, %c0_26], %55 {strides = array<i32>} : memref<4x8x128xf32, #tpu.memory_space<vmem>>, vector<4x8x128xf32>,
    return
  }
  func.func @transform_0(%arg0: i32) -> (i32, i32, i32) {
    %c0_i32 = arith.constant 0 : i32
    %c0_i32_0 = arith.constant 0 : i32
    %c0_i32_1 = arith.constant 0 : i32
    return %arg0, %c0_i32, %c0_i32_0 : i32, i32, i32
  }
  func.func @transform_1(%arg0: i32) -> (i32, i32, i32) {
    %c0_i32 = arith.constant 0 : i32
    %c0_i32_0 = arith.constant 0 : i32
    %c0_i32_1 = arith.constant 0 : i32
    return %arg0, %c0_i32, %c0_i32_0 : i32, i32, i32
  }
  func.func @transform_2(%arg0: i32) -> (i32, i32) {
    %c0_i32 = arith.constant 0 : i32
    %c0_i32_0 = arith.constant 0 : i32
    %c0_i32_1 = arith.constant 0 : i32
    return %c0_i32, %c0_i32_0 : i32, i32
  }
  func.func @transform_3(%arg0: i32) -> (i32, i32) {
    %c0_i32 = arith.constant 0 : i32
    %c0_i32_0 = arith.constant 0 : i32
    %c0_i32_1 = arith.constant 0 : i32
    return %c0_i32, %c0_i32_0 : i32, i32
  }
  func.func @transform_4(%arg0: i32) -> (i32, i32) {
    %c0_i32 = arith.constant 0 : i32
    %c0_i32_0 = arith.constant 0 : i32
    %c0_i32_1 = arith.constant 0 : i32
    return %c0_i32, %c0_i32_0 : i32, i32
  }
  func.func @transform_5(%arg0: i32) -> (i32, i32) {
    %c0_i32 = arith.constant 0 : i32
    %c0_i32_0 = arith.constant 0 : i32
    %c0_i32_1 = arith.constant 0 : i32
    return %c0_i32, %c0_i32_0 : i32, i32
  }
  func.func @transform_6(%arg0: i32) -> (i32, i32, i32) {
    %c0_i32 = arith.constant 0 : i32
    %c0_i32_0 = arith.constant 0 : i32
    %c0_i32_1 = arith.constant 0 : i32
    return %arg0, %c0_i32, %c0_i32_0 : i32, i32, i32
  }
}

</mosaic_0001>

<bundles_post_ra>
// kernel: tpu_custom_call.1
= control target key start
LH: loop header
LB: loop body
LE: loop exit
PB: predicated region body
PF: predicated region fallthrough
CT: control target
= control target key end

     0   :  { %s1876_s0 = inlined_call_operand.hbm [shape: f32[8,8,128], index: 0, kind: input, shape index: {}]   ;;  %s1877_s1 = inlined_call_operand.hbm [shape: f32[8,8,128], index: 1, kind: input, shape index: {}]   ;;  %s1878_s2 = inlined_call_operand.vmem [shape: f32[12,8], index: 2, kind: input, shape index: {}]   ;;  %s1879_s3 = inlined_call_operand.vmem [shape: f32[8,1], index: 3, kind: input, shape index: {}]   ;;  %s1880_s4 = inlined_call_operand.vmem [shape: f32[8,8], index: 4, kind: input, shape index: {}]   ;;  %s1881_s5 = inlined_call_operand.vmem [shape: f32[8,1], index: 5, kind: input, shape index: {}]   ;;  %s1882_s6 = inlined_call_operand.hbm [shape: f32[8,8,128], index: 6, kind: output, shape index: {}]  }
   0x1   :  { %1886 = sst [smem:[#allocation11_spill]] %s1876_s0 }
   0x2   :  { %11 = vsyncpa [#allocation3], 0 }
   0x3   :  { %13 = vsyncpa [#allocation3 + $0x1], 0 }
   0x4   :  { %14 = vsyncpa [#allocation6], 0 }
   0x5   :  { %16 = vsyncpa [#allocation6 + $0x1], 0 }
   0x6   :  { %17 = vsyncpa [#allocation4], 0 }
   0x7   :  { %19 = vsyncpa [#allocation4 + $0x1], 0  ;;  %s1571_s21 = smov 0   ;;  %s1573_s22 = smov 0  }
   0x8   :  { %s1575_s23 = smov 0   ;;  %s1577_s24 = smov 0  }
   0x9 LB: > { %s1592_s25 = sadd.s32 4294967295, %s1524_s24   ;;  %s1209_s26 = sadd.s32 4294967294, %s1524_s24   ;;  %s1524_s24 = sphi %s1577_s24, %s1902_s24   ;;  %s1520_s23 = sphi %s1575_s23, %s1901_s23   ;;  %s1516_s22 = sphi %s1573_s22, %s1900_s22   ;;  %s1512_s21 = sphi %s1571_s21, %s1899_s21  }
   0xa   : > { %s1596_s27 = sadd.s32 1, %s1524_s24   ;;  %s32_s28 = sadd.s32 1, %s1520_s23 }
   0xb   : > { %s29_s29 = ssub.s32 %s1524_s24, %s1596_s27  ;;  %p39_p0 = scmp.ne.s32.totalorder %s1520_s23, %s1516_s22 }
   0xc   : > { %p30_p1 = scmp.eq.s32.totalorder %s29_s29, 0  ;;  %p40_p2 = scmp.eq.s32.totalorder %s1524_s24, 0 }
   0xd   : > { %p45_p3 = scmp.ne.s32.totalorder %s1516_s22, %s1512_s21  ;;  %p46_p4 = scmp.eq.s32.totalorder %s1592_s25, 0 }
   0xe   : > { %s1608_s30 = scalar_select %p30_p1, %s1520_s23, %s32_s28  }
   0xf   : > { %p1610_p5 = por %p40_p2, %p39_p0  ;;  %p1614_p6 = por %p46_p4, %p45_p3 }
  0x10   : > { %p179_p7 = scmp.eq.s32.totalorder %s1592_s25, 1  ;;  %p185_p8 = scmp.eq.s32.totalorder %s1209_s26, 1 }
  0x11   : > { %s1888_s8 = scalar_select %p1614_p6, 1, 0 }
  0x12   : > { %p1319_p10 = scmp.lt.s32.totalorder %s1524_s24, 2  ;;  %p1621_p11 = por %p179_p7, %p39_p0 }
  0x13   : > { %p1625_p12 = por %p185_p8, %p45_p3  ;;  %s1630_s11 = sand.u32 1, %s1520_s23  }
  0x14   : > { %s1889_s9 = scalar_select %p1621_p11, 1, 0 }
  0x15   : > { %s1890_s10 = scalar_select %p1625_p12, 1, 0 }
  0x16   : > { %s1239_s12 = sshll.u32 %s1524_s24, 9  ;;  %s1212_s13 = sshll.u32 %s1630_s11, 5 }
  0x17   : > { %s1891_s0 = sld [smem:[#allocation11_spill]]  ;;  %s221_s17 = scalar_lea.vmem [#allocation2], %s1212_s13 }
  0x18   : > { %s228_s18 = sshll.u32 %s221_s17, 4  ;;  %p1645_p13 = pnand %p1319_p10, %p1610_p5  ;;  %s1649_s18 = int_to_ptr.vmem [resolvable:$true] %s228_s18 }
  0x19   : > { %s218_s20 = scalar_lea.sflag [#allocation3], %s1630_s11 }
  0x1a   : > { %p1396_p1 = pneg %p1645_p13 }
  0x1d   : > { %s1639_s16 = scalar_lea.hbm %s1891_s0, %s1239_s12  ;;  %s1399_s7 = scalar_lea.hbm %s1891_s0, 1024 }
  0x1e   : > { %s1394_s26 = scalar_lea.hbm %s1639_s16, 512  ;;  %p1400_p4 = scmp.lt.u32.totalorder %s1639_s16, %s1891_s0 }
  0x1f   : > { %p1395_p0 = scmp.ne.s32.totalorder %s1639_s16, %s1394_s26  ;;  %p1401_p5 = scmp.lt.u32.totalorder %s1399_s7, %s1394_s26 }
  0x20   : > { %p1403_p8 = scmp.lt.u32.totalorder %s1394_s26, %s1639_s16 }
  0x21   : > { %p1397_p2 = pnand %p1396_p1, %p1395_p0  ;;  %p1402_p7 = por %p1401_p5, %p1400_p4 }
  0x23   : > { %p1398_p3 = pneg %p1397_p2  ;;  %p1404_p10 = por %p1403_p8, %p1402_p7 }
  0x25   : > { %p1405_p9 = pnand %p1404_p10, %p1398_p3 }
  0x27   : > { %1408 = shalt.err (!%p1405_p9)
}
  0x28   : > { %s1409_s17 = scalar_lea.vmem %s1649_s18, 512  ;;  %s1526_s28 = smov [#allocation2]  }
  0x29   : > { %p1410_p0 = scmp.ne.s32.totalorder %s1649_s18, %s1409_s17  ;;  %s1414_s29 = sshll.u32 %s1526_s28, 4  ;;  %s1415_s29 = int_to_ptr.vmem [resolvable:$false] %s1414_s29 }
  0x2a   : > { %s1416_s14 = scalar_lea.vmem %s1415_s29, 1024  ;;  %p1417_p11 = scmp.lt.s32.totalorder %s1649_s18, %s1415_s29 }
  0x2b   : > { %p1412_p2 = pnand %p1410_p0, %p1396_p1  ;;  %p1418_p4 = scmp.lt.s32.totalorder %s1416_s14, %s1409_s17 }
  0x2d   : > { %p1413_p12 = pneg %p1412_p2  ;;  %p1419_p5 = por %p1418_p4, %p1417_p11 }
  0x2f   : > { %p1420_p7 = pnand %p1419_p5, %p1413_p12 }
  0x31   : > { %1423 = shalt.err (!%p1420_p7)
}
  0x32   : > { %s1884_s26 = smov 128   ;;  %s1528_s7 = smov 8  }
  0x33   : > { %1311 = dma.hbm_to_vmem [thread:$0]  (!%p1645_p13), %s1639_s16, 512, %s1649_s18, %s218_s20, %s1884_s26, %s1884_s26, %s1528_s7  }
  0x34   : > { %p1218_p9 = scmp.ge.s32.totalorder %s1524_s24, 1  ;;  %p257_p11 = scmp.lt.s32.totalorder %s1524_s24, 3 }
  0x35   : > { %s1693_s29 = scalar_lea.hbm %s1877_s1, %s1239_s12  ;;  %s242_s14 = scalar_lea.vmem [#allocation5], %s1212_s13 }
  0x36   : > { %p1684_p12 = pnand %p1218_p9, %p257_p11  ;;  %s249_s0 = sshll.u32 %s242_s14, 4  ;;  %s1697_s0 = int_to_ptr.vmem [resolvable:$true] %s249_s0 }
  0x37   : > { %s239_s16 = scalar_lea.sflag [#allocation6], %s1630_s11  ;;  %s1424_s18 = scalar_lea.hbm %s1693_s29, 512 }
  0x38   : > { %p1425_p3 = scmp.ne.s32.totalorder %s1693_s29, %s1424_s18  ;;  %s1429_s12 = scalar_lea.hbm %s1877_s1, 1024 }
  0x39   : > { %p1430_p0 = scmp.lt.u32.totalorder %s1693_s29, %s1877_s1  ;;  %p1431_p2 = scmp.lt.u32.totalorder %s1429_s12, %s1424_s18 }
  0x3a   : > { %p1427_p8 = pnand %p1425_p3, %p1396_p1  ;;  %p1433_p5 = scmp.lt.u32.totalorder %s1424_s18, %s1693_s29 }
  0x3b   : > { %p1432_p4 = por %p1431_p2, %p1430_p0 }
  0x3c   : > { %p1428_p10 = pneg %p1427_p8 }
  0x3d   : > { %p1434_p7 = por %p1433_p5, %p1432_p4 }
  0x3f   : > { %p1435_p9 = pnand %p1434_p7, %p1428_p10 }
  0x41   : > { %1438 = shalt.err (!%p1435_p9)
}
  0x42   : > { %s1439_s13 = scalar_lea.vmem %s1697_s0, 512  ;;  %s1529_s14 = smov [#allocation5]  }
  0x43   : > { %p1440_p11 = scmp.ne.s32.totalorder %s1697_s0, %s1439_s13  ;;  %s1444_s20 = sshll.u32 %s1529_s14, 4  ;;  %s1445_s20 = int_to_ptr.vmem [resolvable:$false] %s1444_s20 }
  0x44   : > { %s1446_s26 = scalar_lea.vmem %s1445_s20, 1024  ;;  %p1447_p6 = scmp.lt.s32.totalorder %s1697_s0, %s1445_s20 }
  0x45   : > { %p1442_p3 = pnand %p1440_p11, %p1396_p1  ;;  %p1448_p0 = scmp.lt.s32.totalorder %s1446_s26, %s1439_s13 }
  0x47   : > { %p1443_p8 = pneg %p1442_p3  ;;  %p1449_p2 = por %p1448_p0, %p1447_p6 }
  0x49   : > { %p1450_p4 = pnand %p1449_p2, %p1443_p8 }
  0x4b   : > { %1453 = shalt.err (!%p1450_p4)
}
  0x4c   : > { %s1894_s18 = smov 128   ;;  %261 = sbr.rel (%p1684_p12) target bundleno = 979 (0x3d3), region = 44 }
  0x4d   : > { %1314 = dma.hbm_to_vmem [thread:$0]  (!%p1645_p13), %s1693_s29, 512, %s1697_s0, %s239_s16, %s1894_s18, %s1894_s18, %s1528_s7  }
  0x4e   : > { %s1731_s17 = sand.u32 (!%p1684_p12), 1, %s1516_s22   ;;  %p1895_p6 = scmp.ne.s32.totalorder (!%p1684_p12), %s1888_s8, 0 }
  0x4f   : > { %s1734_s12 = sshll.u32 (!%p1684_p12), %s1731_s17, 5  ;;  %s264_s19 = scalar_lea.sflag (!%p1684_p12), [#allocation3], %s1731_s17 }
  0x50   : > { %s267_s28 = scalar_lea.vmem (!%p1684_p12), [#allocation2], %s1734_s12 }
  0x53   : > { %1499 = dma.done.wait (%p1895_p6), %s264_s19, 512  }
  0x54   : > { %1501 = vsyncadd (%p1895_p6), %s264_s19, 4294966784  ;;  %s273_s0 = scalar_lea.sflag [#allocation6], %s1731_s17  ;;  %s1744_s11 = scalar_lea.vmem [#allocation5], %s1734_s12 }
  0x55   : > { %1503 = dma.done.wait (%p1895_p6), %s273_s0, 512  }
  0x56   : > { %1505 = vsyncadd (%p1895_p6), %s273_s0, 4294966784  ;;  %vm323_vm0 = vcmask 64512   ;;  %v313_v0 = vld [vmem:[%s267_s28] sm:$0xff]  ;;  %v322_v2 = vld [vmem:[%s1878_s2 + $0x8] sm:$0xf]  ;;  %vm630_vm1 = vcmask 1043456  }
  0x57   : > { %v321_v1 = vld [vmem:[%s1878_s2] sm:$0xff]  ;;  %1262 = vmatprep.subr.mxu0 %v313_v0  ;;  %v314_v3 = vld [vmem:[%s267_s28 + $0x8] sm:$0xff]  ;;  %v315_v4 = vld [vmem:[%s267_s28 + $0x10] sm:$0xff]  ;;  %v1530_v41 = vmov 0.0   ;;  %vm1531_vm2 = vmmov 0   ;;  %v1532_v44 = vmov 0  }
  0x58   : > { %1264 = vmatprep.mubr.msk.f32.mxu0 %vm323_vm0, %v321_v1  ;;  %1263 = vmatpush3.msra.mxu0 %v313_v0  ;;  %v316_v5 = vld [vmem:[%s267_s28 + $0x18] sm:$0xff]  ;;  %v1781_v38 = vld [vmem:[%s1744_s11] sm:$0xff]  ;;  %v1787_v40 = vld [vmem:[%s1744_s11 + $0x8] sm:$0xff]  ;;  %s309_s19 = scalar_lea.vmem [#allocation7], %s1734_s12  ;;  %s1241_s28 = sshll.u32 %s1592_s25, 9 }
  0x59   : > { %1267 = vmatprep.subr.mxu1 %v314_v3  ;;  %1265 = vmatmul.mubr.msk.f32.vlgmr.msra.gmra.mrb[0].mxu0 %vm323_vm0, %v322_v2  ;;  %v725_v39 = vld [vmem:[%s1880_s4] sm:$0xff]  ;;  %v1792_v42 = vld [vmem:[%s1744_s11 + $0x10] sm:$0xff]  ;;  %v1798_v43 = vld [vmem:[%s1744_s11 + $0x18] sm:$0xff]  ;;  %s1113_s0 = sshll.u32 %s309_s19, 4  ;;  %s1830_s7 = scalar_lea.hbm %s1882_s6, %s1241_s28  ;;  %s1832_s0 = int_to_ptr.vmem [resolvable:$true] %s1113_s0 }
  0x5a   : > { %1268 = vmatpush3.msra.mxu1 %v314_v3  ;;  %1269 = vmatprep.mubr.msk.f32.mxu1 %vm323_vm0, %v321_v1  ;;  %s1100_s15 = scalar_lea.sflag [#allocation4], %s1731_s17  ;;  %s1454_s29 = scalar_lea.vmem %s1832_s0, 512 }
  0x5b   : > { %1272 = vmatprep.subr.mxu0 %v315_v4  ;;  %1270 = vmatmul.mubr.msk.f32.vlgmr.msra.gmra.mrb[0].mxu1 %vm323_vm0, %v322_v2  ;;  %p1455_p13 = scmp.ne.s32.totalorder %s1832_s0, %s1454_s29  ;;  %p1896_p1 = scmp.ne.s32.totalorder %s1889_s9, 0 }
  0x5c   : > { %1273 = vmatpush3.msra.mxu0 %v315_v4  ;;  %1274 = vmatprep.mubr.msk.f32.mxu0 %vm323_vm0, %v321_v1  ;;  %s1533_s25 = smov [#allocation7]  }
  0x5d   : > { %1277 = vmatprep.subr.mxu1 %v316_v5  ;;  %1275 = vmatmul.mubr.msk.f32.vlgmr.msra.gmra.mrb[2].mxu0 %vm323_vm0, %v322_v2  ;;  %p1456_p12 = pnand %p1455_p13, %p1896_p1  ;;  %s1458_s16 = sshll.u32 %s1533_s25, 4  ;;  %s1459_s16 = int_to_ptr.vmem [resolvable:$false] %s1458_s16 }
  0x5e   : > { %1278 = vmatpush3.msra.mxu1 %v316_v5  ;;  %1279 = vmatprep.mubr.msk.f32.mxu1 %vm323_vm0, %v321_v1  ;;  %s1460_s8 = scalar_lea.vmem %s1459_s16, 1024  ;;  %p1461_p5 = scmp.lt.s32.totalorder %s1832_s0, %s1459_s16 }
  0x5f   : > { %1280 = vmatmul.mubr.msk.f32.vlgmr.msra.gmra.mrb[2].mxu1 %vm323_vm0, %v322_v2  ;;  %1282 = vmatprep.subr.mxu0 %v1530_v41  ;;  %p1457_p10 = pneg %p1456_p12  ;;  %p1462_p7 = scmp.lt.s32.totalorder %s1460_s8, %s1454_s29 }
  0x60   : > { %1284 = vmatprep.mubr.msk.f32.mxu0 %vm1531_vm2, %v1530_v41  ;;  %1283 = vmatpush3.msra.mxu0 %v1781_v38 }
  0x61   : > { %1287 = vmatprep.subr.mxu1 %v1530_v41  ;;  %1285 = vmatmul.mubr.msk.f32.vlgmr.msra.gmra.mrb[4].mxu0 %vm323_vm0, %v725_v39  ;;  %p1463_p9 = por %p1462_p7, %p1461_p5 }
  0x62   : > { %1288 = vmatpush3.msra.mxu1 %v1787_v40  ;;  %1289 = vmatprep.mubr.msk.f32.mxu1 %vm1531_vm2, %v1530_v41 }
  0x63   : > { %1292 = vmatprep.subr.mxu0 %v1530_v41  ;;  %1290 = vmatmul.mubr.msk.f32.vlgmr.msra.gmra.mrb[4].mxu1 %vm323_vm0, %v725_v39  ;;  %p1464_p11 = pnand %p1463_p9, %p1457_p10 }
  0x64   : > { %1293 = vmatpush3.msra.mxu0 %v1792_v42  ;;  %1294 = vmatprep.mubr.msk.f32.mxu0 %vm1531_vm2, %v1530_v41 }
  0x65   : > { %1297 = vmatprep.subr.mxu1 %v1530_v41  ;;  %1295 = vmatmul.mubr.msk.f32.vlgmr.msra.gmra.mrb[6].mxu0 %vm323_vm0, %v725_v39 }
  0x66   : > { %1298 = vmatpush3.msra.mxu1 %v1798_v43  ;;  %1299 = vmatprep.mubr.msk.f32.mxu1 %vm1531_vm2, %v1530_v41 }
  0x67   : > { %1360 = vset.pattern.permute.xlu0 %v1532_v44  ;;  %1300 = vmatmul.mubr.msk.f32.vlgmr.msra.gmra.mrb[6].mxu1 %vm323_vm0, %v725_v39 }
  0x68   : > { %1361 = vset.pattern.permute.xlu1 %v1532_v44 }
 0x12c   : > { %v1266_v6 = vpop.f32.mrb[0].mxu0 }
 0x12d   : > { %v1764_v7 = vpop.f32.mrb[1].mxu0  ;;  %v631_v8 = vsel %vm630_vm1, %v1266_v6, -inf }
 0x12e   : > { %632 = vmax.xlane.f32.xlu0 %v631_v8  ;;  %v1271_v9 = vpop.f32.mrb[0].mxu1 }
 0x12f   : > { %v1767_v10 = vpop.f32.mrb[1].mxu1  ;;  %v634_v11 = vsel %vm630_vm1, %v1271_v9, -inf }
 0x130   : > { %v1276_v12 = vpop.f32.mrb[2].mxu0 }
 0x131   : > { %v637_v13 = vsel %vm630_vm1, %v1276_v12, -inf  ;;  %v1771_v14 = vpop.f32.mrb[3].mxu0 }
 0x132   : > { %635 = vmax.xlane.f32.xlu0 %v634_v11  ;;  %638 = vmax.xlane.f32.xlu1 %v637_v13  ;;  %v1281_v15 = vpop.f32.mrb[2].mxu1 }
 0x133   : > { %v640_v16 = vsel %vm630_vm1, %v1281_v15, -inf  ;;  %v1774_v17 = vpop.f32.mrb[3].mxu1 }
 0x136   : > { %641 = vmax.xlane.f32.xlu1 %v640_v16  ;;  %v871_v39 = vpop.f32.mrb[4].mxu1 }
 0x1bb   : > { %v633_v18 = vpop.xlane.xlu0 %632 }
 0x1bc   : > { %v643_v19 = vsub.f32 %v1266_v6, %v633_v18 }
 0x1be   : > { %v647_v20 = vmul.f32 1.442695, %v643_v19 }
 0x1bf   : > { %v636_v21 = vpop.xlane.xlu0 %635  ;;  %v639_v22 = vpop.xlane.xlu1 %638 }
 0x1c0   : > { %1362 = vpow2.f32 %v647_v20  ;;  %v644_v23 = vsub.f32 %v1271_v9, %v636_v21  ;;  %v645_v24 = vsub.f32 %v1276_v12, %v639_v22 }
 0x1c2   : > { %v649_v25 = vmul.f32 1.442695, %v644_v23  ;;  %v651_v26 = vmul.f32 1.442695, %v645_v24 }
 0x1c3   : > { %v642_v27 = vpop.xlane.xlu1 %641 }
 0x1c4   : > { %1364 = vpow2.f32 %v649_v25  ;;  %v646_v28 = vsub.f32 %v1281_v15, %v642_v27 }
 0x1c5   : > { %1366 = vpow2.f32 %v651_v26 }
 0x1c6   : > { %v653_v29 = vmul.f32 1.442695, %v646_v28 }
 0x1c8   : > { %1368 = vpow2.f32 %v653_v29 }
 0x1ca   : > { %v1363_v30 = vpop.eup %1362 }
 0x1cb   : > { %v655_v31 = vsel %vm630_vm1, %v1363_v30, 0.0 }
 0x1cc   : > { %656 = vadd.xlane.f32.xlu0 %v655_v31 }
 0x1ce   : > { %v1365_v32 = vpop.eup %1364 }
 0x1cf   : > { %v1367_v33 = vpop.eup %1366  ;;  %v658_v34 = vsel %vm630_vm1, %v1365_v32, 0.0 }
 0x1d0   : > { %659 = vadd.xlane.f32.xlu1 %v658_v34  ;;  %v661_v35 = vsel %vm630_vm1, %v1367_v33, 0.0 }
 0x1d1   : > { %662 = vadd.xlane.f32.xlu0 %v661_v35 }
 0x1d2   : > { %v1369_v36 = vpop.eup %1368 }
 0x1d3   : > { %v664_v37 = vsel %vm630_vm1, %v1369_v36, 0.0 }
 0x1d4   : > { %665 = vadd.xlane.f32.xlu1 %v664_v37 }
 0x259   : > { %v657_v45 = vpop.xlane.xlu0 %656 }
 0x25a   : > { %1370 = vrcp.f32 %v657_v45 }
 0x25d   : > { %v660_v46 = vpop.xlane.xlu1 %659 }
 0x25e   : > { %v663_v47 = vpop.xlane.xlu0 %662  ;;  %1372 = vrcp.f32 %v660_v46 }
 0x25f   : > { %1374 = vrcp.f32 %v663_v47 }
 0x261   : > { %v666_v48 = vpop.xlane.xlu1 %665 }
 0x262   : > { %1376 = vrcp.f32 %v666_v48 }
 0x264   : > { %v1371_v49 = vpop.eup %1370 }
 0x265   : > { %v671_v50 = vmul.f32 %v1371_v49, %v1363_v30 }
 0x267   : > { %v675_v51 = vsel %vm630_vm1, %v671_v50, 0.0 }
 0x268   : > { %v1373_v52 = vpop.eup %1372  ;;  %v676_v53 = vrot.slane %v675_v51, 4 }
 0x269   : > { %v1375_v54 = vpop.eup %1374  ;;  %v672_v55 = vmul.f32 %v1373_v52, %v1365_v32 }
 0x26a   : > { %v677_v56 = vadd.f32 %v676_v53, %v675_v51  ;;  %v673_v57 = vmul.f32 %v1375_v54, %v1367_v33  ;;  %v801_v33 = vpop.f32.mrb[4].mxu0 }
 0x26b   : > { %v682_v58 = vsel %vm630_vm1, %v672_v55, 0.0  ;;  %v1286_v34 = vpop.f32.mrb[5].mxu0 }
 0x26c   : > { %v1377_v59 = vpop.eup %1376  ;;  %v678_v60 = vrot.slane %v677_v56, 2  ;;  %v683_v61 = vrot.slane %v682_v58, 4  ;;  %v689_v62 = vsel %vm630_vm1, %v673_v57, 0.0  ;;  %v941_v45 = vpop.f32.mrb[6].mxu0 }
 0x26d   : > { %v690_v63 = vrot.slane %v689_v62, 4  ;;  %v674_v0 = vmul.f32 %v1377_v59, %v1369_v36  ;;  %v1296_v47 = vpop.f32.mrb[7].mxu0 }
 0x26e   : > { %v679_v1 = vadd.f32 %v678_v60, %v677_v56  ;;  %v684_v2 = vadd.f32 %v683_v61, %v682_v58 }
 0x26f   : > { %v691_v3 = vadd.f32 %v690_v63, %v689_v62  ;;  %v696_v4 = vsel %vm630_vm1, %v674_v0, 0.0 }
 0x270   : > { %v680_v5 = vrot.slane %v679_v1, 1  ;;  %v685_v6 = vrot.slane %v684_v2, 2  ;;  %v697_v8 = vrot.slane %v696_v4, 4 }
 0x271   : > { %v692_v9 = vrot.slane %v691_v3, 2 }
 0x272   : > { %v681_v11 = vadd.f32 %v680_v5, %v679_v1  ;;  %v686_v12 = vadd.f32 %v685_v6, %v684_v2  ;;  %v698_v13 = vadd.f32 %v697_v8, %v696_v4 }
 0x273   : > { %v693_v15 = vadd.f32 %v692_v9, %v691_v3 }
 0x274   : > { %v704_v16 = vmul.f32 0.25, %v681_v11  ;;  %v687_v18 = vrot.slane %v686_v12, 1  ;;  %v699_v19 = vrot.slane %v698_v13, 2 }
 0x275   : > { %v694_v20 = vrot.slane %v693_v15, 1 }
 0x276   : > { %v708_v21 = vmul.f32 %v704_v16, %v1764_v7  ;;  %v688_v22 = vadd.f32 %v687_v18, %v686_v12  ;;  %v700_v23 = vadd.f32 %v699_v19, %v698_v13  ;;  %v726_v7 = vld [vmem:[%s1881_s5] sm:$0xff] }
 0x277   : > { %v695_v24 = vadd.f32 %v694_v20, %v693_v15 }
 0x278   : > { %712 = vadd.xlane.f32.xlu0 %v708_v21  ;;  %v705_v25 = vmul.f32 0.25, %v688_v22  ;;  %v701_v26 = vrot.slane %v700_v23, 1 }
 0x279   : > { %v706_v27 = vmul.f32 0.25, %v695_v24 }
 0x27a   : > { %v709_v28 = vmul.f32 %v705_v25, %v1767_v10  ;;  %v702_v29 = vadd.f32 %v701_v26, %v700_v23  ;;  %v720_v10 = vld [vmem:[%s1879_s3] sm:$0xff] }
 0x27b   : > { %v710_v30 = vmul.f32 %v706_v27, %v1771_v14 }
 0x27c   : > { %714 = vadd.xlane.f32.xlu1 %v709_v28  ;;  %v707_v31 = vmul.f32 0.25, %v702_v29 }
 0x27d   : > { %716 = vadd.xlane.f32.xlu0 %v710_v30 }
 0x27e   : > { %v711_v32 = vmul.f32 %v707_v31, %v1774_v17  ;;  %v1291_v17 = vpop.f32.mrb[5].mxu1 }
 0x27f   : > { %v1011_v48 = vpop.f32.mrb[6].mxu1 }
 0x280   : > { %718 = vadd.xlane.f32.xlu1 %v711_v32  ;;  %v1301_v50 = vpop.f32.mrb[7].mxu1 }
 0x293   : > { %729 = vperm.xlu0 %1360, %v726_v7  }
 0x305   : > { %v713_v35 = vpop.xlane.xlu0 %712 }
 0x306   : > { %v721_v36 = vadd.f32 %v720_v10, %v713_v35 }
 0x308   : > { %1017 = vperm.xlu1 %1361, %v721_v36  }
 0x309   : > { %v715_v14 = vpop.xlane.xlu1 %714 }
 0x30a   : > { %v722_v37 = vadd.f32 %v720_v10, %v715_v14  ;;  %v717_v41 = vpop.xlane.xlu0 %716 }
 0x30b   : > { %v723_v44 = vadd.f32 %v720_v10, %v717_v41 }
 0x30c   : > { %1022 = vperm.xlu1 %1361, %v722_v37  }
 0x30d   : > { %v719_v46 = vpop.xlane.xlu1 %718 }
 0x30e   : > { %v724_v49 = vadd.f32 %v720_v10, %v719_v46 }
 0x310   : > { %1027 = vperm.xlu1 %1361, %v723_v44  }
 0x312   : > { %v730_v51 = vpop.permute.xlu0 %729 }
 0x313   : > { %v802_v52 = vadd.f32 %v801_v33, %v730_v51  ;;  %v872_v55 = vadd.f32 %v871_v39, %v730_v51  ;;  %v942_v60 = vadd.f32 %v941_v45, %v730_v51  ;;  %v1012_v3 = vadd.f32 %v1011_v48, %v730_v51 }
 0x314   : > { %1032 = vperm.xlu1 %1361, %v724_v49  }
 0x387   : > { %v1018_v53 = vpop.permute.xlu1 %1017 }
 0x388   : > { %v1035_v54 = vmul.f32 %v1018_v53, %v802_v52 }
 0x38a   : > { %v1039_v56 = vrot.slane %v1035_v54, 4 }
 0x38b   : > { %v1023_v57 = vpop.permute.xlu1 %1022 }
 0x38c   : > { %v1040_v58 = vadd.f32 %v1039_v56, %v1035_v54  ;;  %v1036_v59 = vmul.f32 %v1023_v57, %v872_v55 }
 0x38e   : > { %v1041_v61 = vrot.slane %v1040_v58, 2  ;;  %v1045_v62 = vrot.slane %v1036_v59, 4 }
 0x38f   : > { %v1028_v63 = vpop.permute.xlu1 %1027 }
 0x390   : > { %v1042_v0 = vadd.f32 %v1041_v61, %v1040_v58  ;;  %v1046_v1 = vadd.f32 %v1045_v62, %v1036_v59  ;;  %v1037_v2 = vmul.f32 %v1028_v63, %v942_v60 }
 0x392   : > { %v1043_v4 = vrot.slane %v1042_v0, 1  ;;  %v1047_v5 = vrot.slane %v1046_v1, 2  ;;  %v1051_v6 = vrot.slane %v1037_v2, 4 }
 0x393   : > { %v1033_v8 = vpop.permute.xlu1 %1032 }
 0x394   : > { %v1044_v9 = vadd.f32 %v1043_v4, %v1042_v0  ;;  %v1048_v11 = vadd.f32 %v1047_v5, %v1046_v1  ;;  %v1052_v12 = vadd.f32 %v1051_v6, %v1037_v2  ;;  %v1038_v13 = vmul.f32 %v1033_v8, %v1012_v3 }
 0x396   : > { %v1063_v15 = vsub.f32 0.0, %v1044_v9  ;;  %v1049_v16 = vrot.slane %v1048_v11, 1  ;;  %v1053_v18 = vrot.slane %v1052_v12, 2  ;;  %v1057_v19 = vrot.slane %v1038_v13, 4 }
 0x398   : > { %v1067_v20 = vmul.f32 1.442695, %v1063_v15  ;;  %v1050_v21 = vadd.f32 %v1049_v16, %v1048_v11  ;;  %v1054_v22 = vadd.f32 %v1053_v18, %v1052_v12  ;;  %v1058_v23 = vadd.f32 %v1057_v19, %v1038_v13 }
 0x39a   : > { %1378 = vpow2.f32 %v1067_v20  ;;  %v1064_v24 = vsub.f32 0.0, %v1050_v21  ;;  %v1055_v25 = vrot.slane %v1054_v22, 1  ;;  %v1059_v26 = vrot.slane %v1058_v23, 2 }
 0x39c   : > { %v1069_v27 = vmul.f32 1.442695, %v1064_v24  ;;  %v1056_v28 = vadd.f32 %v1055_v25, %v1054_v22  ;;  %v1060_v29 = vadd.f32 %v1059_v26, %v1058_v23 }
 0x39e   : > { %1380 = vpow2.f32 %v1069_v27  ;;  %v1065_v30 = vsub.f32 0.0, %v1056_v28  ;;  %v1061_v31 = vrot.slane %v1060_v29, 1 }
 0x3a0   : > { %v1071_v32 = vmul.f32 1.442695, %v1065_v30  ;;  %v1062_v7 = vadd.f32 %v1061_v31, %v1060_v29 }
 0x3a2   : > { %1382 = vpow2.f32 %v1071_v32  ;;  %v1066_v33 = vsub.f32 0.0, %v1062_v7 }
 0x3a4   : > { %v1379_v34 = vpop.eup %1378  ;;  %v1073_v10 = vmul.f32 1.442695, %v1066_v33 }
 0x3a5   : > { %v1075_v35 = vadd.f32 1.0, %v1379_v34 }
 0x3a6   : > { %1384 = vpow2.f32 %v1073_v10 }
 0x3a7   : > { %1386 = vrcp.f32 %v1075_v35 }
 0x3a8   : > { %v1381_v36 = vpop.eup %1380 }
 0x3a9   : > { %v1076_v14 = vadd.f32 1.0, %v1381_v36 }
 0x3ab   : > { %1388 = vrcp.f32 %v1076_v14 }
 0x3ac   : > { %v1383_v37 = vpop.eup %1382 }
 0x3ad   : > { %v1077_v39 = vadd.f32 1.0, %v1383_v37 }
 0x3af   : > { %1390 = vrcp.f32 %v1077_v39 }
 0x3b0   : > { %v1385_v41 = vpop.eup %1384 }
 0x3b1   : > { %v1387_v17 = vpop.eup %1386  ;;  %v1078_v44 = vadd.f32 1.0, %v1385_v41 }
 0x3b2   : > { %v1083_v45 = vadd.f32 1.0, %v1387_v17 }
 0x3b3   : > { %1392 = vrcp.f32 %v1078_v44 }
 0x3b4   : > { %v1087_v46 = vmul.f32 %v1083_v45, %v1781_v38 }
 0x3b5   : > { %v1389_v47 = vpop.eup %1388 }
 0x3b6   : > { %v1091_v48 = vmax.f32 %v1087_v46, 0.0  ;;  %v1084_v49 = vadd.f32 1.0, %v1389_v47 }
 0x3b8   : > { %1095 = vst [vmem:[%s309_s19] sm:$0xff] %v1091_v48  ;;  %v1088_v50 = vmul.f32 %v1084_v49, %v1787_v40 }
 0x3b9   : > { %v1391_v51 = vpop.eup %1390 }
 0x3ba   : > { %v1092_v52 = vmax.f32 %v1088_v50, 0.0  ;;  %v1085_v53 = vadd.f32 1.0, %v1391_v51 }
 0x3bc   : > { %1096 = vst [vmem:[%s309_s19 + $0x8] sm:$0xff] %v1092_v52  ;;  %v1089_v54 = vmul.f32 %v1085_v53, %v1792_v42 }
 0x3bd   : > { %v1393_v55 = vpop.eup %1392 }
 0x3be   : > { %v1093_v56 = vmax.f32 %v1089_v54, 0.0  ;;  %v1086_v57 = vadd.f32 1.0, %v1393_v55 }
 0x3c0   : > { %1097 = vst [vmem:[%s309_s19 + $0x10] sm:$0xff] %v1093_v56  ;;  %v1090_v38 = vmul.f32 %v1086_v57, %v1798_v43 }
 0x3c2   : > { %v1094_v40 = vmax.f32 %v1090_v38, 0.0 }
 0x3c4   : > { %1098 = vst [vmem:[%s309_s19 + $0x18] sm:$0xff] %v1094_v40 }
 0x3c5   : > { %1467 = shalt.err (!%p1464_p11)
}
 0x3c6   : > { %s1468_s13 = scalar_lea.hbm %s1830_s7, 512  ;;  %s1472_s26 = scalar_lea.hbm %s1882_s6, 1024 }
 0x3c7   : > { %p1469_p3 = scmp.ne.s32.totalorder %s1830_s7, %s1468_s13  ;;  %p1473_p2 = scmp.lt.u32.totalorder %s1830_s7, %s1882_s6 }
 0x3c8   : > { %p1474_p4 = scmp.lt.u32.totalorder %s1472_s26, %s1468_s13  ;;  %p1476_p13 = scmp.lt.u32.totalorder %s1468_s13, %s1830_s7 }
 0x3c9   : > { %p1470_p8 = pnand %p1469_p3, %p1896_p1 }
 0x3ca   : > { %p1475_p6 = por %p1474_p4, %p1473_p2 }
 0x3cb   : > { %p1471_p0 = pneg %p1470_p8 }
 0x3cc   : > { %p1477_p12 = por %p1476_p13, %p1475_p6 }
 0x3ce   : > { %p1478_p10 = pnand %p1477_p12, %p1471_p0 }
 0x3d0   : > { %1481 = shalt.err (!%p1478_p10)
}
 0x3d1   : > { %s1534_s28 = smov 128   ;;  %s1535_s12 = smov 8  }
 0x3d2   : > { %1306 = dma.vmem_to_hbm [thread:$0]  (%p1896_p1), %s1832_s0, 512, %s1830_s7, %s1100_s15, %s1534_s28, %s1534_s28, %s1535_s12  }
 0x3d3 PF: > { %s1128_s11 = sand.u32 1, %s1512_s21   ;;  %p1897_p5 = scmp.ne.s32.totalorder %s1890_s10, 0 }
 0x3d4   : > { %p1898_p7 = scmp.ge.s32.totalorder %s1524_s24, 2  ;;  %s1129_s29 = scalar_lea.sflag [#allocation4], %s1128_s11 }
 0x3d6   : > { %p1316_p9 = pnand %p1898_p7, %p1897_p5 }
 0x3d8   : > { %1507 = dma.done.wait (!%p1316_p9), %s1129_s29, 512  }
 0x3d9   : > { %1509 = vsyncadd (!%p1316_p9), %s1129_s29, 4294966784  ;;  %p22_p11 = scmp.ge.s32.totalorder %s1596_s27, 4   ;;  %s1899_s21 = smov %s1516_s22 }
 0x3da   : > { %s1900_s22 = smov %s1520_s23  ;;  %s1901_s23 = smov %s1608_s30 }
 0x3db   : > { %s1902_s24 = smov %s1596_s27  ;;  %24 = sbr.rel (!%p22_p11) target bundleno = 9 (0x9), region = 102 }
 0x3e2   :  { %1134 = vsyncpa [#allocation3], 1 }
 0x3e3   :  { %1136 = vsyncpa [#allocation3 + $0x1], 1 }
 0x3e4   :  { %1137 = vsyncpa [#allocation6], 1 }
 0x3e5   :  { %1139 = vsyncpa [#allocation6 + $0x1], 1 }
 0x3e6   :  { %1140 = vsyncpa [#allocation4], 1 }
 0x3e7   :  { %1142 = vsyncpa [#allocation4 + $0x1], 1 }

</bundles_post_ra>
